<compile_context>
chip_gen: v7x
topology: tpu7x:2x2x1
jax: 0.10.0
libtpu: 0.0.40
codegen_flags: <defaults>
</compile_context>

<pallas_src>
import math

import jax
import jax.numpy as jnp
from jax.experimental import pallas as pl
from jax.experimental.pallas import tpu as pltpu


_LANES = 128
_TARGET_BLOCK_BYTES = 2 * 1024 * 1024  # ~2 MiB of x per grid step


def _pe_add_kernel(x_ref, pe_ref, o_ref):
    # x_ref / o_ref: (KB, TR, 128); pe_ref: (1, TR, 128) -> broadcasts over KB.
    o_ref[...] = (x_ref[...] + pe_ref[...]).astype(o_ref.dtype)


def make_pe_table(embedding_dim, max_len=5000, dtype=jnp.float32):
    """Sinusoidal table identical to the PyTorch buffer, shape (max_len, E)."""
    position = jnp.arange(max_len, dtype=jnp.float32)[:, None]            # (L, 1)
    div_term = jnp.exp(
        jnp.arange(0, embedding_dim, 2, dtype=jnp.float32)
        * (-math.log(10000.0) / embedding_dim))                           # (E//2,)
    angles = position * div_term                                          # (L, E//2)
    # pe[:, 0::2] = sin, pe[:, 1::2] = cos  -> interleave via stack+reshape.
    pe = jnp.stack([jnp.sin(angles), jnp.cos(angles)], axis=-1)
    return pe.reshape(max_len, embedding_dim).astype(dtype)


def positional_encoding(x, pe_table):
    """x: (N, S, E). pe_table: (max_len, E). Returns x + pe_table[None, :S, :]."""
    N, S, E = x.shape
    assert pe_table.shape[1] == E and pe_table.shape[0] >= S

    pe = pe_table[:S].astype(x.dtype)                                     # (S, E)
    itemsize = jnp.dtype(x.dtype).itemsize

    # ---- lane-dense flatten (pad the flat per-batch slice to 128 lanes) ----
    flat = S * E
    pad = (-flat) % _LANES
    x_flat = x.reshape(N, flat)
    pe_flat = pe.reshape(1, flat)
    if pad:
        x_flat = jnp.pad(x_flat, ((0, 0), (0, pad)))
        pe_flat = jnp.pad(pe_flat, ((0, 0), (0, pad)))
    R = (flat + pad) // _LANES
    x3 = x_flat.reshape(N, R, _LANES)
    pe3 = pe_flat.reshape(1, R, _LANES)

    # ---- tile sizing: ~_TARGET_BLOCK_BYTES of x per grid step --------------
    rows_target = max(8, _TARGET_BLOCK_BYTES // (_LANES * itemsize))
    if R <= rows_target or R % 8 != 0:
        TR = R                      # full row extent (always a legal block)
    else:
        TR = (rows_target // 8) * 8  # multiple of 8, < R

    if TR == R:
        # Small per-batch slice: pack KB batch elements per step.
        slice_bytes = R * _LANES * itemsize
        KB = max(1, min(N, _TARGET_BLOCK_BYTES // max(slice_bytes, 1)))
        while N % KB:               # keep the batch grid exact
            KB -= 1
    else:
        KB = 1

    grid = (pl.cdiv(R, TR), pl.cdiv(N, KB))   # pe-varying (row) axis OUTER

    out = pl.pallas_call(
        _pe_add_kernel,
        out_shape=jax.ShapeDtypeStruct((N, R, _LANES), x.dtype),
        grid_spec=pltpu.PrefetchScalarGridSpec(
            num_scalar_prefetch=0,
            grid=grid,
            in_specs=[
                pl.BlockSpec((KB, TR, _LANES), lambda r, n: (n, r, 0)),  # x
                pl.BlockSpec((1, TR, _LANES), lambda r, n: (0, r, 0)),   # pe
            ],
            out_specs=pl.BlockSpec((KB, TR, _LANES), lambda r, n: (n, r, 0)),
        ),
        compiler_params=pltpu.CompilerParams(
            dimension_semantics=("parallel", "parallel")),
    )(x3, pe3)

    out_flat = out.reshape(N, R * _LANES)
    if pad:
        out_flat = out_flat[:, :flat]
    return out_flat.reshape(N, S, E)


def reference_positional_encoding(x, pe_table):
    """Pure-JAX reference mirroring the PyTorch forward."""
    S = x.shape[1]
    return x + pe_table[None, :S, :].astype(x.dtype)


if __name__ == "__main__":
    # Small shapes consistent with the module: batch=2, seq=8, embedding=32.
    N, S, E = 2, 8, 32
    MAX_LEN = 64   # constructor argument of the module (default 5000)

    key = jax.random.PRNGKey(0)
    x = jax.random.normal(key, (N, S, E), jnp.float32)

    pe_table = make_pe_table(E, max_len=MAX_LEN)

    out = positional_encoding(x, pe_table)
    out = jax.block_until_ready(out)

    ref = reference_positional_encoding(x, pe_table)
    assert out.shape == (N, S, E)
    assert jnp.allclose(out, ref, atol=1e-6, rtol=1e-6), "mismatch vs reference"

    print("KERNEL_OK")
</pallas_src>

<mosaic_0001>
module attributes {stable_mosaic.version = 11 : i64} {
  func.func @_pe_add_kernel(%arg0: i32, %arg1: i32, %arg2: memref<2x2x128xf32, #tpu.memory_space<vmem>>, %arg3: memref<1x2x128xf32, #tpu.memory_space<vmem>>, %arg4: memref<2x2x128xf32, #tpu.memory_space<vmem>>) attributes {dimension_semantics = [#tpu.dimension_semantics<parallel>, #tpu.dimension_semantics<parallel>], iteration_bounds = array<i64: 1, 1>, scalar_prefetch = 0 : i64, scratch_operands = 0 : i64, tpu.core_type = #tpu.core_type<tc>, window_params = [{transform_indices = @transform_0, window_bounds = array<i64: 2, 2, 128>}, {transform_indices = @transform_1, window_bounds = array<i64: 1, 2, 128>}, {transform_indices = @transform_2, window_bounds = array<i64: 2, 2, 128>}]} {
    %c0 = arith.constant 0 : index
    %c0_0 = arith.constant 0 : index
    %c0_1 = arith.constant 0 : index
    %0 = vector.load %arg2[%c0, %c0_0, %c0_1] : memref<2x2x128xf32, #tpu.memory_space<vmem>>, vector<2x2x128xf32>
    %c0_2 = arith.constant 0 : index
    %c0_3 = arith.constant 0 : index
    %c0_4 = arith.constant 0 : index
    %1 = vector.load %arg3[%c0_2, %c0_3, %c0_4] : memref<1x2x128xf32, #tpu.memory_space<vmem>>, vector<1x2x128xf32>
    %2 = vector.broadcast %1 : vector<1x2x128xf32> to vector<2x2x128xf32>
    %3 = arith.addf %0, %2 : vector<2x2x128xf32>
    %c0_5 = arith.constant 0 : index
    %c0_6 = arith.constant 0 : index
    %c0_7 = arith.constant 0 : index
    %4 = vector.load %arg4[%c0_5, %c0_6, %c0_7] : memref<2x2x128xf32, #tpu.memory_space<vmem>>, vector<2x2x128xf32>
    tpu.vector_store %arg4[%c0_5, %c0_6, %c0_7], %3 {strides = array<i32>} : memref<2x2x128xf32, #tpu.memory_space<vmem>>, vector<2x2x128xf32>,
    return
  }
  func.func @transform_0(%arg0: i32, %arg1: i32) -> (i32, i32, i32) {
    %c0_i32 = arith.constant 0 : i32
    %c0_i32_0 = arith.constant 0 : i32
    return %arg1, %arg0, %c0_i32 : i32, i32, i32
  }
  func.func @transform_1(%arg0: i32, %arg1: i32) -> (i32, i32, i32) {
    %c0_i32 = arith.constant 0 : i32
    %c0_i32_0 = arith.constant 0 : i32
    %c0_i32_1 = arith.constant 0 : i32
    return %c0_i32, %arg0, %c0_i32_0 : i32, i32, i32
  }
  func.func @transform_2(%arg0: i32, %arg1: i32) -> (i32, i32, i32) {
    %c0_i32 = arith.constant 0 : i32
    %c0_i32_0 = arith.constant 0 : i32
    return %arg1, %arg0, %c0_i32 : i32, i32, i32
  }
}

</mosaic_0001>

<bundles_post_ra>
// kernel: tpu_custom_call.1
= control target key start
LH: loop header
LB: loop body
LE: loop exit
PB: predicated region body
PF: predicated region fallthrough
CT: control target
= control target key end

     0   :  { %7 = vsyncpa [#allocation3], 0  ;;  %s154_s0 = inlined_call_operand.hbm [shape: f32[2,2,128], index: 0, kind: input, shape index: {}]   ;;  %s155_s1 = inlined_call_operand.vmem [shape: f32[1,2,128], index: 1, kind: input, shape index: {}]   ;;  %s156_s2 = inlined_call_operand.hbm [shape: f32[2,2,128], index: 2, kind: output, shape index: {}]  }
   0x1   :  { %8 = vsyncpa [#allocation4], 0  ;;  %s102_s9 = smov [#allocation2]   ;;  %s54_s13 = scalar_lea.hbm %s154_s0, 64 }
   0x2   :  { %s14_s10 = sshll.u32 %s102_s9, 4  ;;  %p55_p0 = scmp.ne.s32.totalorder %s154_s0, %s54_s13  ;;  %s15_s10 = int_to_ptr.vmem [resolvable:$true] %s14_s10 }
   0x3   :  { %p58_p1 = scmp.lt.u32.totalorder %s54_s13, %s154_s0 }
   0x5   :  { %p60_p2 = pnand %p58_p1, %p55_p0 }
   0x7   :  { %63 = shalt.err (!%p60_p2)
}
   0x8   :  { %s64_s18 = scalar_lea.vmem %s15_s10, 64  ;;  %p69_p4 = scmp.lt.s32.totalorder %s15_s10, %s15_s10 }
   0x9   :  { %p65_p3 = scmp.ne.s32.totalorder %s15_s10, %s64_s18  ;;  %p70_p5 = scmp.lt.s32.totalorder %s64_s18, %s64_s18 }
   0xb   :  { %p71_p6 = por %p70_p5, %p69_p4 }
   0xd   :  { %p72_p7 = pnand %p71_p6, %p65_p3 }
   0xf   :  { %75 = shalt.err (!%p72_p7)
}
  0x10   :  { %s103_s19 = smov 32   ;;  %s104_s20 = smov 2  }
  0x11   :  { %20 = dma.hbm_to_vmem [thread:$0]  %s154_s0, 64, %s15_s10, [#allocation3], %s103_s19, %s103_s19, %s104_s20  }
  0x12   :  { %98 = dma.done.wait [#allocation3], 64  }
  0x13   :  { %99 = vsyncadd [#allocation3], 4294967232  ;;  %s105_s23 = smov [#allocation5]   ;;  %v26_v0 = vld [vmem:[#allocation2] sm:$0x3] }
  0x14   :  { %s38_s24 = sshll.u32 %s105_s23, 4  ;;  %v28_v1 = vld [vmem:[%s155_s1] sm:$0x3]  ;;  %v27_v2 = vld [vmem:[#allocation2 + $0x2] sm:$0x3]  ;;  %s39_s24 = int_to_ptr.vmem [resolvable:$true] %s38_s24 }
  0x15   :  { %v29_v3 = vadd.f32 %v28_v1, %v26_v0  ;;  %v30_v4 = vadd.f32 %v28_v1, %v27_v2  ;;  %s76_s27 = scalar_lea.vmem %s39_s24, 64  ;;  %p81_p9 = scmp.lt.s32.totalorder %s39_s24, %s39_s24 }
  0x16   :  { %p77_p8 = scmp.ne.s32.totalorder %s39_s24, %s76_s27  ;;  %p82_p10 = scmp.lt.s32.totalorder %s76_s27, %s76_s27 }
  0x17   :  { %31 = vst [vmem:[#allocation5] sm:$0x3] %v29_v3  ;;  %32 = vst [vmem:[#allocation5 + $0x2] sm:$0x3] %v30_v4 }
  0x18   :  { %p83_p11 = por %p82_p10, %p81_p9 }
  0x1a   :  { %p84_p12 = pnand %p83_p11, %p77_p8 }
  0x1c   :  { %87 = shalt.err (!%p84_p12)
}
  0x1d   :  { %s88_s29 = scalar_lea.hbm %s156_s2, 64 }
  0x1e   :  { %p89_p13 = scmp.ne.s32.totalorder %s156_s2, %s88_s29  ;;  %p92_p0 = scmp.lt.u32.totalorder %s88_s29, %s156_s2 }
  0x20   :  { %p94_p1 = pnand %p92_p0, %p89_p13 }
  0x22   :  { %97 = shalt.err (!%p94_p1)
}
  0x23   :  { %44 = dma.vmem_to_hbm [thread:$0]  %s39_s24, 64, %s156_s2, [#allocation4], %s103_s19, %s103_s19, %s104_s20  }
  0x24   :  { %100 = dma.done.wait [#allocation4], 64  }
  0x25   :  { %101 = vsyncadd [#allocation4], 4294967232 }
  0x26   :  { %48 = vsyncpa [#allocation3], 1 }
  0x27   :  { %49 = vsyncpa [#allocation4], 1 }

</bundles_post_ra>
